<compile_context>
chip_gen: v6e
topology: v6e:2x2x1
jax: 0.10.0
libtpu: 0.0.40
codegen_flags: <defaults>
</compile_context>

<pallas_src>
import jax
import jax.numpy as jnp
from jax.experimental import pallas as pl
from jax.experimental.pallas import tpu as pltpu


def _round_up(x: int, m: int) -> int:
    return ((x + m - 1) // m) * m


def _cdiv(a: int, b: int) -> int:
    return (a + b - 1) // b


def _dynamic_expert_kernel(x_ref, w1_ref, b1_ref, w2_ref, b2_ref, o_ref, acc_ref):
    k = pl.program_id(1)

    @pl.when(k == 0)
    def _():
        acc_ref[...] = jnp.zeros_like(acc_ref)

    # fc1 chunk: (TB, in) @ (in, tk) + (1, tk), bias-add + ReLU in f32 on the VPU.
    h = jnp.dot(x_ref[...], w1_ref[...], preferred_element_type=jnp.float32)
    h = jnp.maximum(h + b1_ref[...], 0.0)

    # fc2 partial: accumulate (TB, tk) @ (tk, out_pad) into the f32 scratch.
    acc_ref[...] += jnp.dot(
        h.astype(w2_ref.dtype), w2_ref[...], preferred_element_type=jnp.float32
    )

    @pl.when(k == pl.num_programs(1) - 1)
    def _():
        o_ref[...] = (acc_ref[...] + b2_ref[...]).astype(o_ref.dtype)


def dynamic_expert(x, w1, b1, w2, b2, *, batch_tile=256, k_tile=512,
                   compute_dtype=None):
    """Fused MLP forward: relu(x @ w1 + b1) @ w2 + b2.

    x:  (..., input_size)            -- arbitrary leading batch dims
    w1: (input_size, hidden_size),   b1: (hidden_size,)
    w2: (hidden_size, output_size),  b2: (output_size,)
    compute_dtype: optionally cast x/w1/w2 (e.g. jnp.bfloat16) for the MXU;
                   accumulation stays in f32.
    returns (..., output_size) in x.dtype.
    """
    lead_shape = x.shape[:-1]
    in_sz = x.shape[-1]
    hidden = w1.shape[1]
    out = w2.shape[1]
    out_dtype = x.dtype

    x2 = x.reshape(-1, in_sz)
    B = x2.shape[0]

    if compute_dtype is not None:
        x2 = x2.astype(compute_dtype)
        w1 = w1.astype(compute_dtype)
        w2 = w2.astype(compute_dtype)

    itemsize = jnp.dtype(x2.dtype).itemsize
    out_itemsize = jnp.dtype(out_dtype).itemsize

    # ---- tile sizes / padding (lane-dense, (8,128)-aligned) ----------------
    tb = min(batch_tile, _round_up(B, 8))            # batch tile (sublanes)
    b_pad = _round_up(B, tb)
    out_pad = _round_up(out, 128)                    # lane-dense output
    hid128 = _round_up(hidden, 128)

    # Adaptive hidden-chunk size: shrink until the double-buffered working
    # set fits a conservative VMEM budget (safe on v7x's 64 MiB VMEM), then
    # balance the chunks so zero-padding waste is < 128 per chunk.
    budget = 40 << 20
    resident = (2 * tb * in_sz * itemsize            # x tiles (double-buffered)
                + 2 * tb * out_pad * out_itemsize    # out tiles
                + tb * out_pad * 4                   # f32 accumulator
                + 2 * out_pad * itemsize)            # b2 (resident)
    tk_cap = min(k_tile, hid128)
    while tk_cap > 128 and (
        resident + 2 * (in_sz * tk_cap + tk_cap * out_pad + tk_cap) * itemsize > budget
    ):
        tk_cap -= 128
    n_k = _cdiv(hid128, tk_cap)
    tk = _round_up(_cdiv(hid128, n_k), 128)
    hidden_pad = n_k * tk

    x_p = jnp.pad(x2, ((0, b_pad - B), (0, 0)))
    w1_p = jnp.pad(w1, ((0, 0), (0, hidden_pad - hidden)))
    b1_p = jnp.pad(b1, ((0, hidden_pad - hidden),)).reshape(1, hidden_pad)
    w2_p = jnp.pad(w2, ((0, hidden_pad - hidden), (0, out_pad - out)))
    b2_p = jnp.pad(b2, ((0, out_pad - out),)).reshape(1, out_pad)

    grid = (b_pad // tb, n_k)

    flops = 2 * b_pad * in_sz * hidden_pad + 2 * b_pad * hidden_pad * out_pad
    bytes_accessed = (
        x_p.size * x_p.dtype.itemsize
        + w1_p.size * w1_p.dtype.itemsize
        + b1_p.size * b1_p.dtype.itemsize
        + w2_p.size * w2_p.dtype.itemsize
        + b2_p.size * b2_p.dtype.itemsize
        + b_pad * out_pad * out_itemsize
    )

    y_p = pl.pallas_call(
        _dynamic_expert_kernel,
        out_shape=jax.ShapeDtypeStruct((b_pad, out_pad), out_dtype),
        grid=grid,
        in_specs=[
            pl.BlockSpec((tb, in_sz), lambda i, k: (i, 0)),        # x tile
            pl.BlockSpec((in_sz, tk), lambda i, k: (0, k)),        # w1 chunk
            pl.BlockSpec((1, tk), lambda i, k: (0, k)),            # b1 chunk
            pl.BlockSpec((tk, out_pad), lambda i, k: (k, 0)),      # w2 chunk
            pl.BlockSpec((1, out_pad), lambda i, k: (0, 0)),       # b2 (resident)
        ],
        out_specs=pl.BlockSpec((tb, out_pad), lambda i, k: (i, 0)),
        scratch_shapes=[pltpu.VMEM((tb, out_pad), jnp.float32)],
        compiler_params=pltpu.CompilerParams(
            dimension_semantics=("parallel", "arbitrary"),
            vmem_limit_bytes=56 << 20,
        ),
        cost_estimate=pl.CostEstimate(
            flops=flops, transcendentals=0, bytes_accessed=bytes_accessed
        ),
    )(x_p, w1_p, b1_p, w2_p, b2_p)

    return y_p[:B, :out].reshape(*lead_shape, out)


if __name__ == "__main__":
    key = jax.random.PRNGKey(0)
    k_x, k_w1, k_b1, k_w2, k_b2 = jax.random.split(key, 5)

    # Small shapes consistent with the module: batch=8, input=32, hidden=64, out=32.
    B, input_size, hidden_size, output_size = 8, 32, 64, 32

    x = jax.random.normal(k_x, (B, input_size), dtype=jnp.float32)

    # Deterministic param init (mimics nn.Linear uniform(-1/sqrt(fan_in), ...)).
    bound1 = 1.0 / jnp.sqrt(input_size)
    bound2 = 1.0 / jnp.sqrt(hidden_size)
    w1 = jax.random.uniform(k_w1, (input_size, hidden_size), jnp.float32, -bound1, bound1)
    b1 = jax.random.uniform(k_b1, (hidden_size,), jnp.float32, -bound1, bound1)
    w2 = jax.random.uniform(k_w2, (hidden_size, output_size), jnp.float32, -bound2, bound2)
    b2 = jax.random.uniform(k_b2, (output_size,), jnp.float32, -bound2, bound2)

    # 2-D batch
    y = dynamic_expert(x, w1, b1, w2, b2)
    jax.block_until_ready(y)
    y_ref = jnp.maximum(x @ w1 + b1, 0.0) @ w2 + b2
    assert y.shape == (B, output_size)
    assert jnp.allclose(y, y_ref, atol=1e-5, rtol=1e-5)

    # Leading batch dims (nn.Linear semantics)
    x3 = x.reshape(2, 4, input_size)
    y3 = dynamic_expert(x3, w1, b1, w2, b2)
    jax.block_until_ready(y3)
    y3_ref = jnp.maximum(x3 @ w1 + b1, 0.0) @ w2 + b2
    assert y3.shape == (2, 4, output_size)
    assert jnp.allclose(y3, y3_ref, atol=1e-5, rtol=1e-5)

    print("KERNEL_OK")
</pallas_src>

<mosaic_0001>
module attributes {stable_mosaic.version = 11 : i64} {
  func.func @_dynamic_expert_kernel(%arg0: i32, %arg1: i32, %arg2: memref<8x32xf32, #tpu.memory_space<vmem>>, %arg3: memref<32x128xf32, #tpu.memory_space<vmem>>, %arg4: memref<1x128xf32, #tpu.memory_space<vmem>>, %arg5: memref<128x128xf32, #tpu.memory_space<vmem>>, %arg6: memref<1x128xf32, #tpu.memory_space<vmem>>, %arg7: memref<8x128xf32, #tpu.memory_space<vmem>>, %arg8: memref<8x128xf32, #tpu.memory_space<vmem>>) attributes {dimension_semantics = [#tpu.dimension_semantics<parallel>, #tpu.dimension_semantics<arbitrary>], iteration_bounds = array<i64: 1, 1>, scalar_prefetch = 0 : i64, scratch_operands = 1 : i64, tpu.core_type = #tpu.core_type<tc>, window_params = [{transform_indices = @transform_0, window_bounds = array<i64: 8, 32>}, {transform_indices = @transform_1, window_bounds = array<i64: 32, 128>}, {transform_indices = @transform_2, window_bounds = array<i64: 1, 128>}, {transform_indices = @transform_3, window_bounds = array<i64: 128, 128>}, {pipeline_mode = #tpu.pipeline_mode<synchronous>, transform_indices = @transform_4, window_bounds = array<i64: 1, 128>}, {transform_indices = @transform_5, window_bounds = array<i64: 8, 128>}]} {
    %c0_i32 = arith.constant 0 : i32
    %0 = arith.cmpi eq, %arg1, %c0_i32 : i32
    %1 = arith.extui %0 : i1 to i32
    %c0_i32_0 = arith.constant 0 : i32
    %2 = arith.cmpi ne, %1, %c0_i32_0 : i32
    scf.if %2 {
      %cst_16 = arith.constant 0.000000e+00 : f32
      %19 = vector.broadcast %cst_16 : f32 to vector<8x128xf32>
      %c0_17 = arith.constant 0 : index
      %c0_18 = arith.constant 0 : index
      %20 = vector.load %arg8[%c0_17, %c0_18] : memref<8x128xf32, #tpu.memory_space<vmem>>, vector<8x128xf32>
      tpu.vector_store %arg8[%c0_17, %c0_18], %19 {strides = array<i32>} : memref<8x128xf32, #tpu.memory_space<vmem>>, vector<8x128xf32>,
    } else {
    }
    %c0 = arith.constant 0 : index
    %c0_1 = arith.constant 0 : index
    %3 = vector.load %arg2[%c0, %c0_1] : memref<8x32xf32, #tpu.memory_space<vmem>>, vector<8x32xf32>
    %c0_2 = arith.constant 0 : index
    %c0_3 = arith.constant 0 : index
    %4 = vector.load %arg3[%c0_2, %c0_3] : memref<32x128xf32, #tpu.memory_space<vmem>>, vector<32x128xf32>
    %cst = arith.constant dense<0.000000e+00> : vector<8x128xf32>
    %5 = tpu.matmul %3, %4, %cst {dimension_numbers = #tpu.dot_dimension_numbers<[1], [0], [0], [1], [0, 0, 1, 1], [], []>} : vector<8x32xf32>, vector<32x128xf32>, vector<8x128xf32> -> vector<8x128xf32>
    %c0_4 = arith.constant 0 : index
    %c0_5 = arith.constant 0 : index
    %6 = vector.load %arg4[%c0_4, %c0_5] : memref<1x128xf32, #tpu.memory_space<vmem>>, vector<1x128xf32>
    %7 = vector.broadcast %6 : vector<1x128xf32> to vector<8x128xf32>
    %8 = arith.addf %5, %7 : vector<8x128xf32>
    %cst_6 = arith.constant 0.000000e+00 : f32
    %9 = vector.broadcast %cst_6 : f32 to vector<8x128xf32>
    %10 = arith.maximumf %8, %9 : vector<8x128xf32>
    %c0_7 = arith.constant 0 : index
    %c0_8 = arith.constant 0 : index
    %11 = vector.load %arg8[%c0_7, %c0_8] : memref<8x128xf32, #tpu.memory_space<vmem>>, vector<8x128xf32>
    %c0_9 = arith.constant 0 : index
    %c0_10 = arith.constant 0 : index
    %12 = vector.load %arg5[%c0_9, %c0_10] : memref<128x128xf32, #tpu.memory_space<vmem>>, vector<128x128xf32>
    %cst_11 = arith.constant dense<0.000000e+00> : vector<8x128xf32>
    %13 = tpu.matmul %10, %12, %cst_11 {dimension_numbers = #tpu.dot_dimension_numbers<[1], [0], [0], [1], [0, 0, 1, 1], [], []>} : vector<8x128xf32>, vector<128x128xf32>, vector<8x128xf32> -> vector<8x128xf32>
    %14 = arith.addf %11, %13 : vector<8x128xf32>
    %c0_12 = arith.constant 0 : index
    %c0_13 = arith.constant 0 : index
    %15 = vector.load %arg8[%c0_12, %c0_13] : memref<8x128xf32, #tpu.memory_space<vmem>>, vector<8x128xf32>
    tpu.vector_store %arg8[%c0_12, %c0_13], %14 {strides = array<i32>} : memref<8x128xf32, #tpu.memory_space<vmem>>, vector<8x128xf32>,
    %c0_i32_14 = arith.constant 0 : i32
    %16 = arith.cmpi eq, %arg1, %c0_i32_14 : i32
    %17 = arith.extui %16 : i1 to i32
    %c0_i32_15 = arith.constant 0 : i32
    %18 = arith.cmpi ne, %17, %c0_i32_15 : i32
    scf.if %18 {
      %c0_16 = arith.constant 0 : index
      %c0_17 = arith.constant 0 : index
      %19 = vector.load %arg8[%c0_16, %c0_17] : memref<8x128xf32, #tpu.memory_space<vmem>>, vector<8x128xf32>
      %c0_18 = arith.constant 0 : index
      %c0_19 = arith.constant 0 : index
      %20 = vector.load %arg6[%c0_18, %c0_19] : memref<1x128xf32, #tpu.memory_space<vmem>>, vector<1x128xf32>
      %21 = vector.broadcast %20 : vector<1x128xf32> to vector<8x128xf32>
      %22 = arith.addf %19, %21 : vector<8x128xf32>
      %c0_20 = arith.constant 0 : index
      %c0_21 = arith.constant 0 : index
      %23 = vector.load %arg7[%c0_20, %c0_21] : memref<8x128xf32, #tpu.memory_space<vmem>>, vector<8x128xf32>
      tpu.vector_store %arg7[%c0_20, %c0_21], %22 {strides = array<i32>} : memref<8x128xf32, #tpu.memory_space<vmem>>, vector<8x128xf32>,
    } else {
    }
    return
  }
  func.func @transform_0(%arg0: i32, %arg1: i32) -> (i32, i32) {
    %c0_i32 = arith.constant 0 : i32
    %c0_i32_0 = arith.constant 0 : i32
    return %arg0, %c0_i32 : i32, i32
  }
  func.func @transform_1(%arg0: i32, %arg1: i32) -> (i32, i32) {
    %c0_i32 = arith.constant 0 : i32
    %c0_i32_0 = arith.constant 0 : i32
    return %c0_i32, %arg1 : i32, i32
  }
  func.func @transform_2(%arg0: i32, %arg1: i32) -> (i32, i32) {
    %c0_i32 = arith.constant 0 : i32
    %c0_i32_0 = arith.constant 0 : i32
    return %c0_i32, %arg1 : i32, i32
  }
  func.func @transform_3(%arg0: i32, %arg1: i32) -> (i32, i32) {
    %c0_i32 = arith.constant 0 : i32
    %c0_i32_0 = arith.constant 0 : i32
    return %arg1, %c0_i32 : i32, i32
  }
  func.func @transform_4(%arg0: i32, %arg1: i32) -> (i32, i32) {
    %c0_i32 = arith.constant 0 : i32
    %c0_i32_0 = arith.constant 0 : i32
    %c0_i32_1 = arith.constant 0 : i32
    return %c0_i32, %c0_i32_0 : i32, i32
  }
  func.func @transform_5(%arg0: i32, %arg1: i32) -> (i32, i32) {
    %c0_i32 = arith.constant 0 : i32
    %c0_i32_0 = arith.constant 0 : i32
    return %arg0, %c0_i32 : i32, i32
  }
}

</mosaic_0001>

<bundles_post_ra>
// kernel: tpu_custom_call.1
= control target key start
LH: loop header
LB: loop body
LE: loop exit
PB: predicated region body
PF: predicated region fallthrough
CT: control target
= control target key end

     0   :  { %10 = vsyncpa [#allocation4], 0  ;;  %s513_s0 = inlined_call_operand.hbm [shape: f32[8,32], index: 0, kind: input, shape index: {}]   ;;  %s514_s1 = inlined_call_operand.hbm [shape: f32[32,128], index: 1, kind: input, shape index: {}]   ;;  %s515_s2 = inlined_call_operand.vmem [shape: f32[1,128], index: 2, kind: input, shape index: {}]   ;;  %s516_s3 = inlined_call_operand.hbm [shape: f32[128,128], index: 3, kind: input, shape index: {}]   ;;  %s517_s4 = inlined_call_operand.vmem [shape: f32[1,128], index: 4, kind: input, shape index: {}]   ;;  %s518_s5 = inlined_call_operand.hbm [shape: f32[8,128], index: 5, kind: output, shape index: {}]  }
   0x1   :  { %11 = vsyncpa [#allocation7], 0 }
   0x2   :  { %12 = vsyncpa [#allocation5], 0  ;;  %s435_s18 = smov [#allocation6]  }
   0x3   :  { %s28_s19 = sshll.u32 %s435_s18, 4  ;;  %s29_s19 = int_to_ptr.vmem [resolvable:$true] %s28_s19 }
   0x4   :  { %s357_s20 = scalar_lea.vmem %s29_s19, 512  ;;  %p362_p1 = scmp.lt.s32.totalorder %s29_s19, %s29_s19 }
   0x5   :  { %p358_p0 = scmp.ne.s32.totalorder %s29_s19, %s357_s20  ;;  %p363_p2 = scmp.lt.s32.totalorder %s357_s20, %s357_s20 }
   0x7   :  { %p364_p3 = por %p363_p2, %p362_p1 }
   0x9   :  { %p365_p4 = pnand %p364_p3, %p358_p0 }
   0xb   :  { %368 = shalt.err (!%p365_p4)
}
   0xc   :  { %s436_s21 = smov 128   ;;  %s437_s22 = smov 8  }
   0xd   :  { %34 = dma.hbm_to_vmem [thread:$0]  %s514_s1, 512, %s29_s19, [#allocation7], %s436_s21, %s436_s21, %s437_s22  }
   0xe   :  { %s438_s25 = smov [#allocation3]   ;;  %s439_s27 = smov [#allocation8]  }
   0xf   :  { %s19_s26 = sshll.u32 %s438_s25, 4  ;;  %s42_s28 = sshll.u32 %s439_s27, 4  ;;  %s20_s26 = int_to_ptr.vmem [resolvable:$true] %s19_s26  ;;  %s43_s28 = int_to_ptr.vmem [resolvable:$true] %s42_s28 }
  0x10   :  { %s377_s29 = scalar_lea.vmem %s20_s26, 128  ;;  %p382_p6 = scmp.lt.s32.totalorder %s20_s26, %s20_s26 }
  0x11   :  { %p378_p5 = scmp.ne.s32.totalorder %s20_s26, %s377_s29  ;;  %p383_p7 = scmp.lt.s32.totalorder %s377_s29, %s377_s29 }
  0x13   :  { %p384_p8 = por %p383_p7, %p382_p6 }
  0x15   :  { %p385_p9 = pnand %p384_p8, %p378_p5 }
  0x17   :  { %388 = shalt.err (!%p385_p9)
}
  0x18   :  { %22 = dma.hbm_to_vmem [thread:$0]  %s513_s0, 128, %s20_s26, [#allocation4]  }
  0x19   :  { %s397_s7 = scalar_lea.vmem %s43_s28, 2048  ;;  %p402_p11 = scmp.lt.s32.totalorder %s43_s28, %s43_s28 }
  0x1a   :  { %p398_p10 = scmp.ne.s32.totalorder %s43_s28, %s397_s7  ;;  %p403_p12 = scmp.lt.s32.totalorder %s397_s7, %s397_s7 }
  0x1c   :  { %p404_p13 = por %p403_p12, %p402_p11 }
  0x1e   :  { %p405_p0 = pnand %p404_p13, %p398_p10 }
  0x20   :  { %408 = shalt.err (!%p405_p0)
}
  0x21   :  { %48 = dma.hbm_to_vmem [thread:$0]  %s516_s3, 2048, %s43_s28, [#allocation7], %s436_s21, %s436_s21, %s437_s22  }
  0x22   :  { %429 = dma.done.wait [#allocation4], 128  }
  0x23   :  { %430 = vsyncadd [#allocation4], 4294967168 }
  0x24   :  { %431 = dma.done.wait [#allocation7], 2560  }
  0x25   :  { %432 = vsyncadd [#allocation7], 4294964736  ;;  %v440_v0 = vmov 0.0   ;;  %vm441_vm0 = vmmov 0   ;;  %v69_v1 = vld [vmem:[#allocation6 + $0x18] sm:$0xff]  ;;  %v68_v2 = vld [vmem:[#allocation6 + $0x10] sm:$0xff] }
  0x26   :  { %295 = vmatprep.subr.mxu0 %v440_v0  ;;  %303 = vmatprep.mubr.msk.f32.mxu0 %vm441_vm0, %v440_v0  ;;  %v168_v3 = vld [vmem:[#allocation8 + $0x78] sm:$0xff]  ;;  %v67_v4 = vld [vmem:[#allocation6 + $0x8] sm:$0xff]  ;;  %v167_v5 = vld [vmem:[#allocation8 + $0x70] sm:$0xff]  ;;  %vm77_vm1 = vcmask 261120   ;;  %s442_s11 = smov [#allocation9]  }
  0x27   :  { %306 = vmatprep.subr.mxu1 %v440_v0  ;;  %338 = vmatprep.mubr.msk.f32.mxu1 %vm441_vm0, %v440_v0  ;;  %v166_v6 = vld [vmem:[#allocation8 + $0x68] sm:$0xff]  ;;  %v66_v7 = vld [vmem:[#allocation6] sm:$0xff]  ;;  %v65_v8 = vld [vmem:[#allocation3] sm:$0xff]  ;;  %s260_s12 = sshll.u32 %s442_s11, 4  ;;  %s261_s12 = int_to_ptr.vmem [resolvable:$true] %s260_s12 }
  0x28   :  { %296 = vmatpush3.msra.mxu0 %v69_v1  ;;  %307 = vmatpush3.msra.mxu1 %v168_v3  ;;  %v165_v9 = vld [vmem:[#allocation8 + $0x60] sm:$0xff]  ;;  %v164_v10 = vld [vmem:[#allocation8 + $0x58] sm:$0xff]  ;;  %v163_v11 = vld [vmem:[#allocation8 + $0x50] sm:$0xff]  ;;  %s409_s13 = scalar_lea.vmem %s261_s12, 128  ;;  %p414_p2 = scmp.lt.s32.totalorder %s261_s12, %s261_s12 }
  0x29   :  { %297 = vmatprep.subr.mxu0 %v440_v0  ;;  %308 = vmatprep.subr.mxu1 %v440_v0  ;;  %v162_v12 = vld [vmem:[#allocation8 + $0x48] sm:$0xff]  ;;  %v161_v13 = vld [vmem:[#allocation8 + $0x40] sm:$0xff]  ;;  %v160_v14 = vld [vmem:[#allocation8 + $0x38] sm:$0xff]  ;;  %p410_p1 = scmp.ne.s32.totalorder %s261_s12, %s409_s13  ;;  %p415_p3 = scmp.lt.s32.totalorder %s409_s13, %s409_s13 }
  0x2a   :  { %298 = vmatpush3.msra.mxu0 %v68_v2  ;;  %309 = vmatpush3.msra.mxu1 %v167_v5  ;;  %v159_v15 = vld [vmem:[#allocation8 + $0x30] sm:$0xff]  ;;  %v158_v16 = vld [vmem:[#allocation8 + $0x28] sm:$0xff]  ;;  %v157_v17 = vld [vmem:[#allocation8 + $0x20] sm:$0xff] }
  0x2b   :  { %299 = vmatprep.subr.mxu0 %v440_v0  ;;  %310 = vmatprep.subr.mxu1 %v440_v0  ;;  %v156_v18 = vld [vmem:[#allocation8 + $0x18] sm:$0xff]  ;;  %v155_v19 = vld [vmem:[#allocation8 + $0x10] sm:$0xff]  ;;  %v154_v20 = vld [vmem:[#allocation8 + $0x8] sm:$0xff]  ;;  %p416_p4 = por %p415_p3, %p414_p2 }
  0x2c   :  { %300 = vmatpush3.msra.mxu0 %v67_v4  ;;  %311 = vmatpush3.msra.mxu1 %v166_v6  ;;  %v153_v21 = vld [vmem:[#allocation8] sm:$0xff]  ;;  %v270_v22 = vld [vmem:[%s515_s2] ss:$0 sm:$0xff] }
  0x2d   :  { %301 = vmatprep.subr.mxu0 %v440_v0  ;;  %312 = vmatprep.subr.mxu1 %v440_v0  ;;  %v272_v27 = vld [vmem:[%s517_s4] ss:$0 sm:$0xff]  ;;  %p417_p5 = pnand %p416_p4, %p410_p1 }
  0x2e   :  { %302 = vmatpush3.msra.mxu0 %v66_v7  ;;  %313 = vmatpush3.msra.mxu1 %v165_v9 }
  0x2f   :  { %304 = vmatmul.mubr.msk.f32.vlgmr.msra.gmra.mxu0 %vm77_vm1, %v65_v8  ;;  %314 = vmatprep.subr.mxu1 %v440_v0 }
  0x30   :  { %315 = vmatpush3.msra.mxu1 %v164_v10 }
  0x31   :  { %316 = vmatprep.subr.mxu1 %v440_v0 }
  0x32   :  { %317 = vmatpush3.msra.mxu1 %v163_v11 }
  0x33   :  { %318 = vmatprep.subr.mxu1 %v440_v0 }
  0x34   :  { %319 = vmatpush3.msra.mxu1 %v162_v12 }
  0x35   :  { %320 = vmatprep.subr.mxu1 %v440_v0 }
  0x36   :  { %321 = vmatpush3.msra.mxu1 %v161_v13 }
  0x37   :  { %322 = vmatprep.subr.mxu1 %v440_v0 }
  0x38   :  { %323 = vmatpush3.msra.mxu1 %v160_v14 }
  0x39   :  { %324 = vmatprep.subr.mxu1 %v440_v0 }
  0x3a   :  { %325 = vmatpush3.msra.mxu1 %v159_v15 }
  0x3b   :  { %326 = vmatprep.subr.mxu1 %v440_v0 }
  0x3c   :  { %327 = vmatpush3.msra.mxu1 %v158_v16 }
  0x3d   :  { %328 = vmatprep.subr.mxu1 %v440_v0 }
  0x3e   :  { %329 = vmatpush3.msra.mxu1 %v157_v17 }
  0x3f   :  { %330 = vmatprep.subr.mxu1 %v440_v0 }
  0x40   :  { %331 = vmatpush3.msra.mxu1 %v156_v18 }
  0x41   :  { %332 = vmatprep.subr.mxu1 %v440_v0 }
  0x42   :  { %333 = vmatpush3.msra.mxu1 %v155_v19 }
  0x43   :  { %334 = vmatprep.subr.mxu1 %v440_v0 }
  0x44   :  { %335 = vmatpush3.msra.mxu1 %v154_v20 }
  0x45   :  { %336 = vmatprep.subr.mxu1 %v440_v0 }
  0x46   :  { %337 = vmatpush3.msra.mxu1 %v153_v21 }
  0xef   :  { %v147_v23 = vpop.f32.mrf.mxu0 }
  0xf0   :  { %v148_v24 = vadd.f32 %v270_v22, %v147_v23 }
  0xf1   :  { %v305_v25 = vpop.f32.mrf.mxu0 }
  0xf2   :  { %v151_v26 = vmax.f32 %v148_v24, 0.0 }
  0xf4   :  { %339 = vmatmul.mubr.f32.vlgmr.msra.gmra.mxu1 %v151_v26 }
 0x1b4   :  { %v235_v28 = vpop.f32.mrf.mxu1 }
 0x1b5   :  { %v252_v29 = vadd.f32 %v272_v27, %v235_v28 }
 0x1b6   :  { %v340_v30 = vpop.f32.mrf.mxu1 }
 0x1b7   :  { %253 = vst [vmem:[#allocation9] sm:$0xff] %v252_v29 }
 0x1b8   :  { %420 = shalt.err (!%p417_p5)
}
 0x1b9   :  { %263 = dma.vmem_to_hbm [thread:$0]  %s261_s12, 128, %s518_s5, [#allocation5]  }
 0x1ba   :  { %433 = dma.done.wait [#allocation5], 128  }
 0x1bb   :  { %434 = vsyncadd [#allocation5], 4294967168 }
 0x1bc   :  { %267 = vsyncpa [#allocation4], 1 }
 0x1bd   :  { %268 = vsyncpa [#allocation7], 1 }
 0x1be   :  { %269 = vsyncpa [#allocation5], 1 }

</bundles_post_ra>
